<compile_context>
chip_gen: v5e
topology: v5e:2x2
jax: 0.10.0
libtpu: 0.0.40
codegen_flags: <defaults>
</compile_context>

<pallas_src>
import jax
import jax.numpy as jnp
from jax.experimental import pallas as pl
from jax.experimental.pallas import tpu as pltpu

SUBLANE_PACK = 16  # bf16 rows per vreg along the sublane axis


def _round_up(x, m):
    return ((x + m - 1) // m) * m


# ----------------------------------------------------------------------------
# Pallas kernel: fused (1x1 conv -> LeakyReLU -> 1x1 conv -> selective sigmoid)
# operating channel-major on an NCHW slab.
# ----------------------------------------------------------------------------
def _pred_head_kernel(x_ref, w1t_ref, b1_ref, w2t_ref, b2_ref,
                      sig_mask_ref, sub_ref, out_ref):
    # x_ref:      (1, Cin, THW) f32   one image's (channels, spatial-tile) slab
    # w1t_ref:    (HID, Cin)    f32   conv1 weight, transposed at init
    # b1_ref:     (HID, 1)      f32
    # w2t_ref:    (DPAD, HID)   f32   conv2 weight, transposed + zero-padded rows
    # b2_ref / sig_mask_ref / sub_ref: (DPAD, 1) f32 per-output-channel constants
    # out_ref:    (1, DPAD, THW)      lanes = spatial positions, sublanes = channels
    x = x_ref[0]                                                  # (Cin, THW)
    h = jnp.dot(w1t_ref[...], x, preferred_element_type=jnp.float32) + b1_ref[...]
    # TODO(synk): Dropout2d(p=0.3) is train-time stochastic channel masking;
    # this kernel implements the eval-mode identity.
    h = jnp.maximum(h, 0.01 * h)                                  # LeakyReLU (slope 0.01), f32
    y = jnp.dot(w2t_ref[...], h, preferred_element_type=jnp.float32) + b2_ref[...]
    sig = jax.nn.sigmoid(y) - sub_ref[...]
    out = jnp.where(sig_mask_ref[...] > 0.0, sig, y)
    out_ref[0] = out.astype(out_ref.dtype)


def _pick_tile_hw(hw, batch):
    # Small maps (e.g. 7x7 -> 49): one exact full-extent block per image.  No
    # ragged masked block, and grid=(B, 1) already feeds both v7x TCs for B>=2.
    if hw <= 1024 and (batch >= 2 or hw < 256):
        return hw
    # Otherwise: lane-dense tiles (multiples of 128).  Target <=1024 lanes per
    # step (amortizes the ~0.35us per-grid-step overhead) and >=2 near-equal
    # tiles when a single image must be split across v7x's two TensorCores.
    n_tiles = max(-(-hw // 1024), 2 if batch == 1 else 1)
    return _round_up(-(-hw // n_tiles), 128)


def _pallas_pred_head(x3d, w1t, b1c, w2t, b2c, sig_mask, sub, out_dtype):
    B, cin, hw = x3d.shape
    hid = w1t.shape[0]
    dpad = w2t.shape[0]
    tile_hw = _pick_tile_hw(hw, B)
    grid = (B, pl.cdiv(hw, tile_hw))

    n = B * hw
    cost = pl.CostEstimate(
        flops=2 * n * (cin * hid + hid * dpad),
        transcendentals=n * dpad,
        bytes_accessed=(n * cin * x3d.dtype.itemsize
                        + n * dpad * jnp.dtype(out_dtype).itemsize
                        + (hid * cin + hid + dpad * hid + 3 * dpad) * 4),
    )

    return pl.pallas_call(
        _pred_head_kernel,
        out_shape=jax.ShapeDtypeStruct((B, dpad, hw), out_dtype),
        grid_spec=pltpu.PrefetchScalarGridSpec(
            num_scalar_prefetch=0,
            grid=grid,
            in_specs=[
                pl.BlockSpec((1, cin, tile_hw), lambda b, s: (b, 0, s)),
                pl.BlockSpec((hid, cin),  lambda b, s: (0, 0)),
                pl.BlockSpec((hid, 1),    lambda b, s: (0, 0)),
                pl.BlockSpec((dpad, hid), lambda b, s: (0, 0)),
                pl.BlockSpec((dpad, 1),   lambda b, s: (0, 0)),
                pl.BlockSpec((dpad, 1),   lambda b, s: (0, 0)),
                pl.BlockSpec((dpad, 1),   lambda b, s: (0, 0)),
            ],
            out_specs=pl.BlockSpec((1, dpad, tile_hw), lambda b, s: (b, 0, s)),
        ),
        compiler_params=pltpu.CompilerParams(
            dimension_semantics=("parallel", "parallel")),
        cost_estimate=cost,
    )(x3d, w1t, b1c, w2t, b2c, sig_mask, sub)


# ----------------------------------------------------------------------------
# JAX wrapper mirroring the PyTorch PredictionNetwork
# ----------------------------------------------------------------------------
class PredictionNetwork:
    def __init__(self, in_dim, hidden_dim=128, num_anchors=9, num_classes=20,
                 drop_ratio=0.3, key=None, out_dtype=jnp.bfloat16):
        assert num_classes != 0 and num_anchors != 0
        self.num_classes = num_classes
        self.num_anchors = num_anchors
        self.out_dtype = out_dtype
        A, C = num_anchors, num_classes
        dout = 5 * A + C
        dpad = _round_up(dout, SUBLANE_PACK)   # channels live on sublanes now
        self.dout = dout
        self.dpad = dpad

        if key is None:
            key = jax.random.PRNGKey(0)
        k1, k2, k3, k4 = jax.random.split(key, 4)
        # Deterministic synthetic init (Conv2d 1x1 weights as channel matmuls).
        s1 = 1.0 / (in_dim ** 0.5)
        s2 = 1.0 / (hidden_dim ** 0.5)
        w1 = jax.random.uniform(k1, (in_dim, hidden_dim), jnp.float32, -s1, s1)
        b1 = jax.random.uniform(k2, (hidden_dim,), jnp.float32, -s1, s1)
        w2 = jax.random.uniform(k3, (hidden_dim, dout), jnp.float32, -s2, s2)
        b2 = jax.random.uniform(k4, (dout,), jnp.float32, -s2, s2)

        # Channel-major operands (transposed once at init; matmuls stay f32).
        self.w1t = jnp.transpose(w1)                                   # (HID, Cin)
        self.b1c = b1.reshape(hidden_dim, 1)                           # (HID, 1)
        self.w2t = jnp.pad(jnp.transpose(w2), ((0, dpad - dout), (0, 0)))   # (DPAD, HID)
        self.b2c = jnp.pad(b2.reshape(dout, 1), ((0, dpad - dout), (0, 0)))  # (DPAD, 1)

        # Per-output-channel post-processing flags (column vectors).
        # Channel j < 5*A corresponds to anchor a=j//5, component c=j%5:
        #   c==0 -> sigmoid (conf); c in {1,2} -> sigmoid - 0.5; c in {3,4} -> raw.
        # Class-score channels (>= 5*A) and padded channels -> raw.
        sig_mask = [0.0] * dpad
        sub = [0.0] * dpad
        for j in range(5 * A):
            c = j % 5
            if c == 0:
                sig_mask[j] = 1.0
            elif c in (1, 2):
                sig_mask[j] = 1.0
                sub[j] = 0.5
        self.sig_mask = jnp.asarray(sig_mask, jnp.float32).reshape(dpad, 1)
        self.sub = jnp.asarray(sub, jnp.float32).reshape(dpad, 1)

    # ---- anchor extraction helpers (plain-JAX glue, matches torch semantics) ----
    def _extract_anchor_data(self, anchor_data, anchor_idx):
        B, A, D, H, W = anchor_data.shape
        flat = jnp.transpose(anchor_data, (0, 1, 3, 4, 2)).reshape(-1, D)
        return flat[anchor_idx]

    def _extract_class_scores(self, all_scores, anchor_idx):
        B, C, H, W = all_scores.shape
        A = self.num_anchors
        s = jnp.transpose(all_scores, (0, 2, 3, 1))              # (B, H, W, C)
        s = jnp.broadcast_to(s[:, None], (B, A, H, W, C))        # expand over anchors
        s = s.reshape(B * A * H * W, C)
        return s[anchor_idx]

    # ---- forward ----
    def __call__(self, features, pos_anchor_idx=None, neg_anchor_idx=None):
        A, C = self.num_anchors, self.num_classes
        B, Cin, H, W = features.shape

        # NCHW -> (B, Cin, H*W) is a free reshape; no transpose, no dtype cast.
        x3d = features.reshape(B, Cin, H * W)
        out3d = _pallas_pred_head(x3d, self.w1t, self.b1c, self.w2t, self.b2c,
                                  self.sig_mask, self.sub, self.out_dtype)
        # Already NCHW: (B, DPAD, H, W); drop padded channels with a cheap slice.
        out = out3d.reshape(B, self.dpad, H, W)[:, :self.dout]

        class_scores = out[:, 5 * A:, :, :]                      # (B, C, H, W)
        anchors = out[:, :5 * A, :, :].reshape(B, A, 5, H, W)
        conf_scores = anchors[:, :, 0:1, :, :]                   # (B, A, 1, H, W), sigmoided
        offsets = anchors[:, :, 1:, :, :]                        # (B, A, 4, H, W)

        if pos_anchor_idx is not None:
            offsets = self._extract_anchor_data(offsets, pos_anchor_idx)
            class_scores = self._extract_class_scores(class_scores, pos_anchor_idx)
            pos = self._extract_anchor_data(conf_scores, pos_anchor_idx)
            neg = self._extract_anchor_data(conf_scores, neg_anchor_idx)
            conf_scores = jnp.concatenate((pos, neg), axis=0)    # (2M, 1)
        else:
            # torch's .squeeze() would also drop B/H/W when they equal 1; we keep
            # the documented (B, A, H, W) by squeezing only the component dim.
            conf_scores = jnp.squeeze(conf_scores, axis=2)       # (B, A, H, W)
        return conf_scores, offsets, class_scores


if __name__ == "__main__":
    key = jax.random.PRNGKey(0)
    k_feat, k_params, k_idx = jax.random.split(key, 3)

    B, in_dim, H, W = 2, 32, 7, 7
    A, C = 9, 20
    features = jax.random.normal(k_feat, (B, in_dim, H, W), jnp.float32)

    net = PredictionNetwork(in_dim, hidden_dim=128, num_anchors=A, num_classes=C,
                            key=k_params)

    # Inference path
    conf_i, off_i, cls_i = net(features)
    jax.block_until_ready((conf_i, off_i, cls_i))
    assert conf_i.shape == (B, A, H, W)
    assert off_i.shape == (B, A, 4, H, W)
    assert cls_i.shape == (B, C, H, W)

    # Pure-JAX f32 reference of the fused head (tolerance check; kernel output is bf16).
    x2 = jnp.transpose(features, (0, 2, 3, 1)).reshape(-1, in_dim)
    h_pre = x2 @ net.w1t.T + net.b1c[:, 0][None, :]
    h_ref = jnp.maximum(h_pre, 0.01 * h_pre)
    y_ref = (h_ref @ net.w2t.T + net.b2c[:, 0][None, :])[:, :net.dout]
    mask_r = net.sig_mask[:net.dout, 0][None, :]
    sub_r = net.sub[:net.dout, 0][None, :]
    out_ref2d = jnp.where(mask_r > 0, jax.nn.sigmoid(y_ref) - sub_r, y_ref)
    out_ref = jnp.transpose(out_ref2d.reshape(B, H, W, net.dout), (0, 3, 1, 2))
    anch_ref = out_ref[:, :5 * A].reshape(B, A, 5, H, W)
    assert jnp.allclose(conf_i.astype(jnp.float32), anch_ref[:, :, 0], atol=3e-2, rtol=3e-2)
    assert jnp.allclose(off_i.astype(jnp.float32), anch_ref[:, :, 1:], atol=3e-2, rtol=3e-2)
    assert jnp.allclose(cls_i.astype(jnp.float32), out_ref[:, 5 * A:], atol=3e-2, rtol=3e-2)

    # Training path (anchor extraction)
    M = 5
    total = B * A * H * W
    pos_idx = jax.random.randint(k_idx, (M,), 0, total)
    neg_idx = (pos_idx + 7) % total
    conf_t, off_t, cls_t = net(features, pos_idx, neg_idx)
    jax.block_until_ready((conf_t, off_t, cls_t))
    assert conf_t.shape == (2 * M, 1)
    assert off_t.shape == (M, 4)
    assert cls_t.shape == (M, C)

    print("KERNEL_OK")
</pallas_src>

<mosaic_0001>
module attributes {stable_mosaic.version = 11 : i64} {
  func.func @_pred_head_kernel(%arg0: i32, %arg1: i32, %arg2: memref<1x32x49xf32, #tpu.memory_space<vmem>>, %arg3: memref<128x32xf32, #tpu.memory_space<vmem>>, %arg4: memref<128x1xf32, #tpu.memory_space<vmem>>, %arg5: memref<80x128xf32, #tpu.memory_space<vmem>>, %arg6: memref<80x1xf32, #tpu.memory_space<vmem>>, %arg7: memref<80x1xf32, #tpu.memory_space<vmem>>, %arg8: memref<80x1xf32, #tpu.memory_space<vmem>>, %arg9: memref<1x80x49xbf16, #tpu.memory_space<vmem>>) attributes {dimension_semantics = [#tpu.dimension_semantics<parallel>, #tpu.dimension_semantics<parallel>], iteration_bounds = array<i64: 2, 1>, scalar_prefetch = 0 : i64, scratch_operands = 0 : i64, tpu.core_type = #tpu.core_type<tc>, window_params = [{transform_indices = @transform_0, window_bounds = array<i64: 1, 32, 49>}, {pipeline_mode = #tpu.pipeline_mode<synchronous>, transform_indices = @transform_1, window_bounds = array<i64: 128, 32>}, {pipeline_mode = #tpu.pipeline_mode<synchronous>, transform_indices = @transform_2, window_bounds = array<i64: 128, 1>}, {pipeline_mode = #tpu.pipeline_mode<synchronous>, transform_indices = @transform_3, window_bounds = array<i64: 80, 128>}, {pipeline_mode = #tpu.pipeline_mode<synchronous>, transform_indices = @transform_4, window_bounds = array<i64: 80, 1>}, {pipeline_mode = #tpu.pipeline_mode<synchronous>, transform_indices = @transform_5, window_bounds = array<i64: 80, 1>}, {pipeline_mode = #tpu.pipeline_mode<synchronous>, transform_indices = @transform_6, window_bounds = array<i64: 80, 1>}, {transform_indices = @transform_7, window_bounds = array<i64: 1, 80, 49>}]} {
    %c0 = arith.constant 0 : index
    %c0_0 = arith.constant 0 : index
    %c0_1 = arith.constant 0 : index
    %0 = vector.load %arg2[%c0, %c0_0, %c0_1] : memref<1x32x49xf32, #tpu.memory_space<vmem>>, vector<1x32x49xf32>
    %1 = vector.shape_cast %0 : vector<1x32x49xf32> to vector<32x49xf32>
    %c0_2 = arith.constant 0 : index
    %c0_3 = arith.constant 0 : index
    %2 = vector.load %arg3[%c0_2, %c0_3] : memref<128x32xf32, #tpu.memory_space<vmem>>, vector<128x32xf32>
    %cst = arith.constant dense<0.000000e+00> : vector<128x49xf32>
    %3 = tpu.matmul %2, %1, %cst {dimension_numbers = #tpu.dot_dimension_numbers<[1], [0], [0], [1], [0, 0, 1, 1], [], []>} : vector<128x32xf32>, vector<32x49xf32>, vector<128x49xf32> -> vector<128x49xf32>
    %c0_4 = arith.constant 0 : index
    %c0_5 = arith.constant 0 : index
    %4 = vector.load %arg4[%c0_4, %c0_5] : memref<128x1xf32, #tpu.memory_space<vmem>>, vector<128x1xf32>
    %5 = vector.broadcast %4 : vector<128x1xf32> to vector<128x49xf32>
    %6 = arith.addf %3, %5 : vector<128x49xf32>
    %cst_6 = arith.constant 0.00999999977 : f32
    %7 = vector.broadcast %cst_6 : f32 to vector<128x49xf32>
    %8 = arith.mulf %7, %6 : vector<128x49xf32>
    %9 = arith.maximumf %6, %8 : vector<128x49xf32>
    %c0_7 = arith.constant 0 : index
    %c0_8 = arith.constant 0 : index
    %10 = vector.load %arg5[%c0_7, %c0_8] : memref<80x128xf32, #tpu.memory_space<vmem>>, vector<80x128xf32>
    %cst_9 = arith.constant dense<0.000000e+00> : vector<80x49xf32>
    %11 = tpu.matmul %10, %9, %cst_9 {dimension_numbers = #tpu.dot_dimension_numbers<[1], [0], [0], [1], [0, 0, 1, 1], [], []>} : vector<80x128xf32>, vector<128x49xf32>, vector<80x49xf32> -> vector<80x49xf32>
    %c0_10 = arith.constant 0 : index
    %c0_11 = arith.constant 0 : index
    %12 = vector.load %arg6[%c0_10, %c0_11] : memref<80x1xf32, #tpu.memory_space<vmem>>, vector<80x1xf32>
    %13 = vector.broadcast %12 : vector<80x1xf32> to vector<80x49xf32>
    %14 = arith.addf %11, %13 : vector<80x49xf32>
    %15 = arith.negf %14 : vector<80x49xf32>
    %16 = math.exp %15 : vector<80x49xf32>
    %cst_12 = arith.constant 1.000000e+00 : f32
    %17 = vector.broadcast %cst_12 : f32 to vector<80x49xf32>
    %18 = arith.addf %17, %16 : vector<80x49xf32>
    %19 = arith.divf %17, %18 : vector<80x49xf32>
    %c0_13 = arith.constant 0 : index
    %c0_14 = arith.constant 0 : index
    %20 = vector.load %arg8[%c0_13, %c0_14] : memref<80x1xf32, #tpu.memory_space<vmem>>, vector<80x1xf32>
    %21 = vector.broadcast %20 : vector<80x1xf32> to vector<80x49xf32>
    %22 = arith.subf %19, %21 : vector<80x49xf32>
    %c0_15 = arith.constant 0 : index
    %c0_16 = arith.constant 0 : index
    %23 = vector.load %arg7[%c0_15, %c0_16] : memref<80x1xf32, #tpu.memory_space<vmem>>, vector<80x1xf32>
    %cst_17 = arith.constant 0.000000e+00 : f32
    %24 = vector.broadcast %cst_17 : f32 to vector<80x1xf32>
    %25 = arith.cmpf ogt, %23, %24 : vector<80x1xf32>
    %26 = vector.shape_cast %25 : vector<80x1xi1> to vector<80x1xi1>
    %27 = vector.broadcast %26 : vector<80x1xi1> to vector<80x49xi1>
    %28 = arith.select %27, %22, %14 : vector<80x49xi1>, vector<80x49xf32>
    %29 = arith.truncf %28 : vector<80x49xf32> to vector<80x49xbf16>
    %c0_18 = arith.constant 0 : index
    %c0_19 = arith.constant 0 : index
    %c0_20 = arith.constant 0 : index
    %30 = vector.load %arg9[%c0_18, %c0_19, %c0_20] : memref<1x80x49xbf16, #tpu.memory_space<vmem>>, vector<1x80x49xbf16>
    %31 = vector.shape_cast %30 : vector<1x80x49xbf16> to vector<80x49xbf16>
    %32 = vector.shape_cast %29 : vector<80x49xbf16> to vector<1x80x49xbf16>
    tpu.vector_store %arg9[%c0_18, %c0_19, %c0_20], %32 {strides = array<i32>} : memref<1x80x49xbf16, #tpu.memory_space<vmem>>, vector<1x80x49xbf16>,
    return
  }
  func.func @transform_0(%arg0: i32, %arg1: i32) -> (i32, i32, i32) {
    %c0_i32 = arith.constant 0 : i32
    %c0_i32_0 = arith.constant 0 : i32
    return %arg0, %c0_i32, %arg1 : i32, i32, i32
  }
  func.func @transform_1(%arg0: i32, %arg1: i32) -> (i32, i32) {
    %c0_i32 = arith.constant 0 : i32
    %c0_i32_0 = arith.constant 0 : i32
    %c0_i32_1 = arith.constant 0 : i32
    return %c0_i32, %c0_i32_0 : i32, i32
  }
  func.func @transform_2(%arg0: i32, %arg1: i32) -> (i32, i32) {
    %c0_i32 = arith.constant 0 : i32
    %c0_i32_0 = arith.constant 0 : i32
    %c0_i32_1 = arith.constant 0 : i32
    return %c0_i32, %c0_i32_0 : i32, i32
  }
  func.func @transform_3(%arg0: i32, %arg1: i32) -> (i32, i32) {
    %c0_i32 = arith.constant 0 : i32
    %c0_i32_0 = arith.constant 0 : i32
    %c0_i32_1 = arith.constant 0 : i32
    return %c0_i32, %c0_i32_0 : i32, i32
  }
  func.func @transform_4(%arg0: i32, %arg1: i32) -> (i32, i32) {
    %c0_i32 = arith.constant 0 : i32
    %c0_i32_0 = arith.constant 0 : i32
    %c0_i32_1 = arith.constant 0 : i32
    return %c0_i32, %c0_i32_0 : i32, i32
  }
  func.func @transform_5(%arg0: i32, %arg1: i32) -> (i32, i32) {
    %c0_i32 = arith.constant 0 : i32
    %c0_i32_0 = arith.constant 0 : i32
    %c0_i32_1 = arith.constant 0 : i32
    return %c0_i32, %c0_i32_0 : i32, i32
  }
  func.func @transform_6(%arg0: i32, %arg1: i32) -> (i32, i32) {
    %c0_i32 = arith.constant 0 : i32
    %c0_i32_0 = arith.constant 0 : i32
    %c0_i32_1 = arith.constant 0 : i32
    return %c0_i32, %c0_i32_0 : i32, i32
  }
  func.func @transform_7(%arg0: i32, %arg1: i32) -> (i32, i32, i32) {
    %c0_i32 = arith.constant 0 : i32
    %c0_i32_0 = arith.constant 0 : i32
    return %arg0, %c0_i32, %arg1 : i32, i32, i32
  }
}

</mosaic_0001>

<bundles_post_ra>
// kernel: tpu_custom_call.1
= control target key start
LH: loop header
LB: loop body
LE: loop exit
PB: predicated region body
PF: predicated region fallthrough
CT: control target
= control target key end

     0   :  { %s1324_s24 = smov 0   ;;  %s1326_s25 = smov 0   ;;  %s1815_s0 = inlined_call_operand.vmem [shape: f32[2,32,49], index: 0, kind: input, shape index: {}]   ;;  %s1816_s1 = inlined_call_operand.vmem [shape: f32[128,32], index: 1, kind: input, shape index: {}]   ;;  %s1817_s2 = inlined_call_operand.vmem [shape: f32[128,1], index: 2, kind: input, shape index: {}]   ;;  %s1818_s3 = inlined_call_operand.vmem [shape: f32[80,128], index: 3, kind: input, shape index: {}]   ;;  %s1819_s4 = inlined_call_operand.vmem [shape: f32[80,1], index: 4, kind: input, shape index: {}]   ;;  %s1820_s5 = inlined_call_operand.vmem [shape: f32[80,1], index: 5, kind: input, shape index: {}]   ;;  %s1821_s6 = inlined_call_operand.vmem [shape: f32[80,1], index: 6, kind: input, shape index: {}]   ;;  %s1822_s7 = inlined_call_operand.vmem [shape: bf16[2,80,49], index: 7, kind: output, shape index: {}]  }
   0x1   :  { %s1328_s26 = smov 0  }
   0x2 LB: > { %s29_s27 = sadd.s32 1, %s1277_s25  ;;  %p1137_p0 = scmp.ge.s32.totalorder %s1281_s26, 1  ;;  %s1281_s26 = sphi %s1328_s26, %s17_s26   ;;  %s1277_s25 = sphi %s1326_s25, %s1830_s25   ;;  %s1273_s24 = sphi %s1324_s24, %s1829_s24  }
   0x3   : > { %p31_p1 = scmp.ge.s32.totalorder %s29_s27, 2  ;;  %p256_p2 = scmp.lt.s32.totalorder %s1281_s26, 3 }
   0x5   : > { %s1832_s27 = smov (%p31_p1, %s29_s27), 0  ;;  %p257_p3 = pnand %p1137_p0, %p256_p2 }
   0x6   : > { %p294_p4 = scmp.lt.s32.totalorder (!%p257_p3), %s1273_s24, 1 }
   0x7   : > { %260 = sbr.rel (%p257_p3) target bundleno = 456 (0x1c8), region = 48 }
   0xc   : > { %v345_v0 = vld [vmem:[%s1817_s2 + $0x78] sm:$0xff]  ;;  %v343_v1 = vld [vmem:[%s1817_s2 + $0x68] sm:$0xff]  ;;  %v1283_v3 = vmov 0   ;;  %s1834_s24 = smov (!%p294_p4, %s1273_s24), 1  ;;  %v342_v6 = vld [vmem:[%s1817_s2 + $0x60] sm:$0xff]  ;;  %vm426_vm0 = vcmask 261120  }
   0xd   : > { %v341_v2 = vld [vmem:[%s1817_s2 + $0x58] sm:$0xff]  ;;  %1218 = vset.pattern.permute.xlu2 %v1283_v3  ;;  %1217 = vset.pattern.permute.xlu1 %v1283_v3  ;;  %s1169_s11 = sshll.u32 %s1834_s24, 5  ;;  %v344_v7 = vld [vmem:[%s1817_s2 + $0x70] sm:$0xff]  ;;  %v314_v11 = vld [vmem:[%s1816_s1] sm:$0xff]  ;;  %vm1039_vm14 = vcmask 396288   ;;  %s1190_s20 = smul.u32 40, %s1834_s24 }
   0xe   : > { %1216 = vset.pattern.permute.xlu0 %v1283_v3  ;;  %413 = vperm.xlu1 %1217, %v343_v1   ;;  %s301_s14 = scalar_lea.vmem %s1815_s0, %s1169_s11  ;;  %v340_v8 = vld [vmem:[%s1817_s2 + $0x50] sm:$0xff]  ;;  %v322_v12 = vld [vmem:[%s1816_s1 + $0x40] sm:$0xff]  ;;  %v339_v14 = vld [vmem:[%s1817_s2 + $0x48] sm:$0xff] }
   0xf   : > { %423 = vperm.xlu0 %1216, %v345_v0   ;;  %403 = vperm.xlu2 %1218, %v341_v2   ;;  %v313_v4 = vld [vmem:[%s301_s14 + $0x18] sm:$0xff]  ;;  %v312_v5 = vld [vmem:[%s301_s14 + $0x10] sm:$0xff]  ;;  %v311_v9 = vld [vmem:[%s301_s14 + $0x8] sm:$0xff]  ;;  %s1701_s22 = scalar_lea.vmem %s1822_s7, %s1190_s20 }
  0x10   : > { %487 = vmatpush.msra.mxu0 %v313_v4  ;;  %1170 = vmatpush.msra.mxu2 %v313_v4  ;;  %v310_v10 = vld [vmem:[%s301_s14] sm:$0xff]  ;;  %v337_v15 = vld [vmem:[%s1817_s2 + $0x38] sm:$0xff]  ;;  %v315_v16 = vld [vmem:[%s1816_s1 + $0x8] sm:$0xff] }
  0x11   : > { %v338_v13 = vld [vmem:[%s1817_s2 + $0x40] sm:$0xff]  ;;  %v323_v17 = vld [vmem:[%s1816_s1 + $0x48] sm:$0xff]  ;;  %v336_v19 = vld [vmem:[%s1817_s2 + $0x30] sm:$0xff] }
  0x12   : > { %488 = vmatpush.msra.mxu0 %v312_v5  ;;  %1171 = vmatpush.msra.mxu2 %v312_v5  ;;  %v335_v18 = vld [vmem:[%s1817_s2 + $0x28] sm:$0xff]  ;;  %v334_v20 = vld [vmem:[%s1817_s2 + $0x20] sm:$0xff]  ;;  %v316_v21 = vld [vmem:[%s1816_s1 + $0x10] sm:$0xff] }
  0x13   : > { %v324_v22 = vld [vmem:[%s1816_s1 + $0x50] sm:$0xff]  ;;  %v333_v24 = vld [vmem:[%s1817_s2 + $0x18] sm:$0xff]  ;;  %v331_v25 = vld [vmem:[%s1817_s2 + $0x8] sm:$0xff] }
  0x14   : > { %489 = vmatpush.msra.mxu0 %v311_v9  ;;  %1172 = vmatpush.msra.mxu2 %v311_v9  ;;  %v332_v23 = vld [vmem:[%s1817_s2 + $0x10] sm:$0xff]  ;;  %v317_v26 = vld [vmem:[%s1816_s1 + $0x18] sm:$0xff]  ;;  %v582_v28 = vld [vmem:[%s1819_s4] sm:$0xff] }
  0x15   : > { %v325_v27 = vld [vmem:[%s1816_s1 + $0x58] sm:$0xff]  ;;  %v583_v29 = vld [vmem:[%s1819_s4 + $0x8] sm:$0xff]  ;;  %v330_v30 = vld [vmem:[%s1817_s2] sm:$0xff] }
  0x16   : > { %408 = vperm.xlu1 %1217, %v342_v6   ;;  %490 = vmatpush.msra.mxu0 %v310_v10  ;;  %v318_v31 = vld [vmem:[%s1816_s1 + $0x20] sm:$0xff]  ;;  %v585_v33 = vld [vmem:[%s1819_s4 + $0x18] sm:$0xff]  ;;  %v584_v35 = vld [vmem:[%s1819_s4 + $0x10] sm:$0xff] }
  0x17   : > { %418 = vperm.xlu0 %1216, %v344_v7   ;;  %398 = vperm.xlu2 %1218, %v340_v8   ;;  %v326_v32 = vld [vmem:[%s1816_s1 + $0x60] sm:$0xff]  ;;  %v319_v36 = vld [vmem:[%s1816_s1 + $0x28] sm:$0xff]  ;;  %v588_v38 = vld [vmem:[%s1819_s4 + $0x30] sm:$0xff] }
  0x18   : > { %1173 = vmatpush.msra.mxu2 %v310_v10  ;;  %1141 = vmatmul.msk.f32.vlgmr.msra.gmra.mxu0 %vm426_vm0, %v314_v11  ;;  %v586_v34 = vld [vmem:[%s1819_s4 + $0x20] sm:$0xff]  ;;  %v327_v37 = vld [vmem:[%s1816_s1 + $0x68] sm:$0xff]  ;;  %v589_v39 = vld [vmem:[%s1819_s4 + $0x38] sm:$0xff] }
  0x19   : > { %1149 = vmatmul.msk.f32.vlgmr.msra.gmra.mxu2 %vm426_vm0, %v322_v12  ;;  %v587_v40 = vld [vmem:[%s1819_s4 + $0x28] sm:$0xff]  ;;  %v320_v41 = vld [vmem:[%s1816_s1 + $0x30] sm:$0xff]  ;;  %v879_v44 = vld [vmem:[%s1821_s6] sm:$0xff] }
  0x1a   : > { %v328_v42 = vld [vmem:[%s1816_s1 + $0x70] sm:$0xff]  ;;  %v591_v43 = vld [vmem:[%s1819_s4 + $0x48] sm:$0xff]  ;;  %v590_v45 = vld [vmem:[%s1819_s4 + $0x40] sm:$0xff] }
  0x1b   : > { %v321_v46 = vld [vmem:[%s1816_s1 + $0x38] sm:$0xff]  ;;  %v881_v48 = vld [vmem:[%s1821_s6 + $0x10] sm:$0xff]  ;;  %v880_v50 = vld [vmem:[%s1821_s6 + $0x8] sm:$0xff] }
  0x1c   : > { %v329_v47 = vld [vmem:[%s1816_s1 + $0x78] sm:$0xff]  ;;  %v884_v51 = vld [vmem:[%s1821_s6 + $0x28] sm:$0xff]  ;;  %v885_v52 = vld [vmem:[%s1821_s6 + $0x30] sm:$0xff] }
  0x1d   : > { %v882_v49 = vld [vmem:[%s1821_s6 + $0x18] sm:$0xff]  ;;  %v883_v53 = vld [vmem:[%s1821_s6 + $0x20] sm:$0xff]  ;;  %v888_v55 = vld [vmem:[%s1821_s6 + $0x48] sm:$0xff] }
  0x1e   : > { %388 = vperm.xlu1 %1217, %v338_v13   ;;  %v887_v54 = vld [vmem:[%s1821_s6 + $0x40] sm:$0xff]  ;;  %v886_v56 = vld [vmem:[%s1821_s6 + $0x38] sm:$0xff]  ;;  %v950_v57 = vld [vmem:[%s1820_s5 + $0x8] sm:$0xff] }
  0x1f   : > { %393 = vperm.xlu0 %1216, %v339_v14   ;;  %383 = vperm.xlu2 %1218, %v337_v15   ;;  %v951_v58 = vld [vmem:[%s1820_s5 + $0x10] sm:$0xff]  ;;  %v949_v59 = vld [vmem:[%s1820_s5] sm:$0xff]  ;;  %vm960_vm1 = vcmp.gt.f32.partialorder %v950_v57, 0.0  ;;  %v954_v0 = vld [vmem:[%s1820_s5 + $0x28] sm:$0xff] }
  0x20   : > { %1142 = vmatmul.msk.f32.gmra.mxu0 %vm426_vm0, %v315_v16  ;;  %vm961_vm2 = vcmp.gt.f32.partialorder %v951_v58, 0.0  ;;  %vm959_vm3 = vcmp.gt.f32.partialorder %v949_v59, 0.0  ;;  %v970_v60 = vsel %vm960_vm1, 1, %v1283_v3  ;;  %v953_v63 = vld [vmem:[%s1820_s5 + $0x20] sm:$0xff]  ;;  %v952_v1 = vld [vmem:[%s1820_s5 + $0x18] sm:$0xff]  ;;  %vm964_vm5 = vcmp.gt.f32.partialorder %v954_v0, 0.0 }
  0x21   : > { %1150 = vmatmul.msk.f32.gmra.mxu2 %vm426_vm0, %v323_v17  ;;  %v971_v61 = vsel %vm961_vm2, 1, %v1283_v3  ;;  %v969_v62 = vsel %vm959_vm3, 1, %v1283_v3  ;;  %vm963_vm4 = vcmp.gt.f32.partialorder %v953_v63, 0.0  ;;  %vm962_vm6 = vcmp.gt.f32.partialorder %v952_v1, 0.0  ;;  %v956_v6 = vld [vmem:[%s1820_s5 + $0x38] sm:$0xff]  ;;  %v957_v7 = vld [vmem:[%s1820_s5 + $0x40] sm:$0xff] }
  0x22   : > { %v973_v2 = vsel %vm963_vm4, 1, %v1283_v3  ;;  %v974_v4 = vsel %vm964_vm5, 1, %v1283_v3  ;;  %v972_v5 = vsel %vm962_vm6, 1, %v1283_v3  ;;  %v955_v8 = vld [vmem:[%s1820_s5 + $0x30] sm:$0xff]  ;;  %vm966_vm7 = vcmp.gt.f32.partialorder %v956_v6, 0.0  ;;  %v958_v12 = vld [vmem:[%s1820_s5 + $0x48] sm:$0xff] }
  0x23   : > { %vm967_vm8 = vcmp.gt.f32.partialorder %v957_v7, 0.0  ;;  %vm965_vm9 = vcmp.gt.f32.partialorder %v955_v8, 0.0  ;;  %v976_v9 = vsel %vm966_vm7, 1, %v1283_v3  ;;  %vm968_vm10 = vcmp.gt.f32.partialorder %v958_v12, 0.0 }
  0x24   : > { %v977_v10 = vsel %vm967_vm8, 1, %v1283_v3  ;;  %v975_v11 = vsel %vm965_vm9, 1, %v1283_v3  ;;  %v978_v13 = vsel %vm968_vm10, 1, %v1283_v3 }
  0x26   : > { %373 = vperm.xlu1 %1217, %v335_v18  }
  0x27   : > { %378 = vperm.xlu0 %1216, %v336_v19   ;;  %368 = vperm.xlu2 %1218, %v334_v20  }
  0x28   : > { %1143 = vmatmul.msk.f32.gmra.mxu0 %vm426_vm0, %v316_v21 }
  0x29   : > { %1151 = vmatmul.msk.f32.gmra.mxu2 %vm426_vm0, %v324_v22 }
  0x2e   : > { %358 = vperm.xlu1 %1217, %v332_v23  }
  0x2f   : > { %363 = vperm.xlu0 %1216, %v333_v24   ;;  %353 = vperm.xlu2 %1218, %v331_v25  }
  0x30   : > { %1144 = vmatmul.msk.f32.gmra.mxu0 %vm426_vm0, %v317_v26 }
  0x31   : > { %1152 = vmatmul.msk.f32.gmra.mxu2 %vm426_vm0, %v325_v27 }
  0x36   : > { %594 = vperm.xlu1 %1217, %v582_v28  }
  0x37   : > { %599 = vperm.xlu2 %1218, %v583_v29   ;;  %348 = vperm.xlu0 %1216, %v330_v30  }
  0x38   : > { %1145 = vmatmul.msk.f32.gmra.mxu0 %vm426_vm0, %v318_v31 }
  0x39   : > { %1153 = vmatmul.msk.f32.gmra.mxu2 %vm426_vm0, %v326_v32 }
  0x3e   : > { %609 = vperm.xlu1 %1217, %v585_v33  }
  0x3f   : > { %614 = vperm.xlu2 %1218, %v586_v34   ;;  %604 = vperm.xlu0 %1216, %v584_v35  }
  0x40   : > { %1146 = vmatmul.msk.f32.gmra.mxu0 %vm426_vm0, %v319_v36 }
  0x41   : > { %1154 = vmatmul.msk.f32.gmra.mxu2 %vm426_vm0, %v327_v37 }
  0x46   : > { %624 = vperm.xlu1 %1217, %v588_v38  }
  0x47   : > { %629 = vperm.xlu2 %1218, %v589_v39   ;;  %619 = vperm.xlu0 %1216, %v587_v40  }
  0x48   : > { %1147 = vmatmul.msk.f32.gmra.mxu0 %vm426_vm0, %v320_v41 }
  0x49   : > { %1155 = vmatmul.msk.f32.gmra.mxu2 %vm426_vm0, %v328_v42 }
  0x4e   : > { %639 = vperm.xlu1 %1217, %v591_v43  }
  0x4f   : > { %891 = vperm.xlu2 %1218, %v879_v44   ;;  %634 = vperm.xlu0 %1216, %v590_v45  }
  0x50   : > { %1148 = vmatmul.msk.f32.gmra.mxu0 %vm426_vm0, %v321_v46 }
  0x51   : > { %1156 = vmatmul.msk.f32.gmra.mxu2 %vm426_vm0, %v329_v47 }
  0x56   : > { %901 = vperm.xlu1 %1217, %v881_v48  }
  0x57   : > { %906 = vperm.xlu2 %1218, %v882_v49   ;;  %896 = vperm.xlu0 %1216, %v880_v50  }
  0x5e   : > { %916 = vperm.xlu1 %1217, %v884_v51  }
  0x5f   : > { %921 = vperm.xlu2 %1218, %v885_v52   ;;  %911 = vperm.xlu0 %1216, %v883_v53  }
  0x66   : > { %931 = vperm.xlu1 %1217, %v887_v54  }
  0x67   : > { %936 = vperm.xlu2 %1218, %v888_v55   ;;  %926 = vperm.xlu0 %1216, %v886_v56  }
  0x69   : > { %v404_v26 = vpop.permute.xlu2 %403 }
  0x6e   : > { %983 = vperm.xlu1 %1217, %v970_v60  }
  0x6f   : > { %986 = vperm.xlu2 %1218, %v971_v61   ;;  %980 = vperm.xlu0 %1216, %v969_v62  }
  0x71   : > { %v399_v31 = vpop.permute.xlu2 %398 }
  0x76   : > { %992 = vperm.xlu1 %1217, %v973_v2  }
  0x77   : > { %995 = vperm.xlu2 %1218, %v974_v4   ;;  %989 = vperm.xlu0 %1216, %v972_v5  }
  0x79   : > { %v384_v42 = vpop.permute.xlu2 %383 }
  0x7e   : > { %1001 = vperm.xlu1 %1217, %v976_v9  }
  0x7f   : > { %1004 = vperm.xlu2 %1218, %v977_v10   ;;  %998 = vperm.xlu0 %1216, %v975_v11  }
  0x80   : > { %v414_v25 = vpop.permute.xlu1 %413 }
  0x81   : > { %v424_v22 = vpop.permute.xlu0 %423  ;;  %v369_v61 = vpop.permute.xlu2 %368 }
  0x87   : > { %1007 = vperm.xlu0 %1216, %v978_v13  }
  0x88   : > { %v409_v29 = vpop.permute.xlu1 %408 }
  0x89   : > { %v419_v3 = vpop.permute.xlu0 %418 }
  0x90   : > { %v389_v38 = vpop.permute.xlu1 %388 }
  0x91   : > { %v394_v32 = vpop.permute.xlu0 %393 }
  0x95   : > { %v1563_v14 = vpop.f32.mrf.mxu0 }
  0x98   : > { %v374_v57 = vpop.permute.xlu1 %373 }
  0x99   : > { %v379_v46 = vpop.permute.xlu0 %378 }
  0x9c   : > { %v516_v15 = vpop.f32.mrf.mxu2 }
  0x9d   : > { %v1565_v16 = vpop.f32.mrf.mxu0  ;;  %v517_v54 = vadd.f32 %v516_v15, %v389_v38  ;;  %v581_v38 = vld [vmem:[%s1818_s3 + $0x48] sm:$0xff] }
  0x9f   : > { %v548_v62 = vmul.f32 0.01, %v517_v54 }
  0xa0   : > { %v359_v12 = vpop.permute.xlu1 %358 }
  0xa1   : > { %v364_v1 = vpop.permute.xlu0 %363  ;;  %v564_v8 = vmax.f32 %v517_v54, %v548_v62 }
  0xa4   : > { %v519_v17 = vpop.f32.mrf.mxu2 }
  0xa5   : > { %v1567_v18 = vpop.f32.mrf.mxu0  ;;  %v520_v50 = vadd.f32 %v519_v17, %v394_v32  ;;  %v578_v32 = vld [vmem:[%s1818_s3 + $0x30] sm:$0xff] }
  0xa6   : > { %v499_v13 = vadd.f32 %v1567_v18, %v359_v12 }
  0xa7   : > { %v549_v58 = vmul.f32 0.01, %v520_v50 }
  0xa9   : > { %v565_v5 = vmax.f32 %v520_v50, %v549_v58 }
  0xac   : > { %v522_v19 = vpop.f32.mrf.mxu2 }
  0xad   : > { %v1569_v21 = vpop.f32.mrf.mxu0  ;;  %v523_v47 = vadd.f32 %v522_v19, %v399_v31  ;;  %v354_v19 = vpop.permute.xlu2 %353  ;;  %v573_v31 = vld [vmem:[%s1818_s3 + $0x8] sm:$0xff] }
  0xae   : > { %v502_v9 = vadd.f32 %v1569_v21, %v364_v1  ;;  %v542_v21 = vmul.f32 0.01, %v499_v13 }
  0xaf   : > { %v550_v55 = vmul.f32 0.01, %v523_v47 }
  0xb1   : > { %v566_v0 = vmax.f32 %v523_v47, %v550_v55 }
  0xb4   : > { %v525_v20 = vpop.f32.mrf.mxu2 }
  0xb5   : > { %v504_v24 = vpop.f32.mrf.mxu0  ;;  %v526_v43 = vadd.f32 %v525_v20, %v404_v26  ;;  %v496_v20 = vadd.f32 %v1565_v16, %v354_v19 }
  0xb6   : > { %v505_v6 = vadd.f32 %v504_v24, %v369_v61  ;;  %v349_v24 = vpop.permute.xlu0 %348 }
  0xb7   : > { %v551_v51 = vmul.f32 0.01, %v526_v43 }
  0xb8   : > { %v544_v15 = vmul.f32 0.01, %v505_v6 }
  0xb9   : > { %v567_v60 = vmax.f32 %v526_v43, %v551_v51 }
  0xba   : > { %v560_v26 = vmax.f32 %v505_v6, %v544_v15 }
  0xbc   : > { %v528_v23 = vpop.f32.mrf.mxu2 }
  0xbd   : > { %v507_v28 = vpop.f32.mrf.mxu0  ;;  %v529_v39 = vadd.f32 %v528_v23, %v409_v29 }
  0xbe   : > { %v508_v2 = vadd.f32 %v507_v28, %v374_v57  ;;  %v558_v28 = vmax.f32 %v499_v13, %v542_v21 }
  0xbf   : > { %v552_v48 = vmul.f32 0.01, %v529_v39 }
  0xc0   : > { %v545_v10 = vmul.f32 0.01, %v508_v2 }
  0xc1   : > { %v568_v56 = vmax.f32 %v529_v39, %v552_v48  ;;  %v600_v39 = vpop.permute.xlu2 %599 }
  0xc2   : > { %v561_v23 = vmax.f32 %v508_v2, %v545_v10 }
  0xc4   : > { %v531_v27 = vpop.f32.mrf.mxu2 }
  0xc5   : > { %v510_v34 = vpop.f32.mrf.mxu0  ;;  %v532_v36 = vadd.f32 %v531_v27, %v414_v25  ;;  %v493_v25 = vadd.f32 %v1563_v14, %v349_v24  ;;  %v541_v27 = vmul.f32 0.01, %v496_v20  ;;  %v572_v14 = vld [vmem:[%s1818_s3] sm:$0xff] }
  0xc6   : > { %v511_v63 = vadd.f32 %v510_v34, %v379_v46  ;;  %v579_v34 = vld [vmem:[%s1818_s3 + $0x38] sm:$0xff] }
  0xc7   : > { %v553_v44 = vmul.f32 0.01, %v532_v36  ;;  %v557_v16 = vmax.f32 %v496_v20, %v541_v27 }
  0xc8   : > { %v546_v7 = vmul.f32 0.01, %v511_v63 }
  0xc9   : > { %v569_v52 = vmax.f32 %v532_v36, %v553_v44  ;;  %v580_v36 = vld [vmem:[%s1818_s3 + $0x40] sm:$0xff] }
  0xca   : > { %v562_v17 = vmax.f32 %v511_v63, %v546_v7 }
  0xcc   : > { %v534_v30 = vpop.f32.mrf.mxu2 }
  0xcd   : > { %v535_v33 = vadd.f32 %v534_v30, %v419_v3  ;;  %v513_v53 = vpop.f32.mrf.mxu0  ;;  %v540_v3 = vmul.f32 0.01, %v493_v25  ;;  %v577_v30 = vld [vmem:[%s1818_s3 + $0x28] sm:$0xff] }
  0xce   : > { %v514_v59 = vadd.f32 %v513_v53, %v384_v42  ;;  %v605_v42 = vpop.permute.xlu0 %604 }
  0xcf   : > { %v554_v40 = vmul.f32 0.01, %v535_v33  ;;  %v556_v29 = vmax.f32 %v493_v25, %v540_v3 }
  0xd0   : > { %v547_v4 = vmul.f32 0.01, %v514_v59 }
  0xd1   : > { %v570_v49 = vmax.f32 %v535_v33, %v554_v40  ;;  %v574_v33 = vld [vmem:[%s1818_s3 + $0x10] sm:$0xff]  ;;  %v1605_v40 = vpop.permute.xlu2 %614 }
  0xd2   : > { %v563_v11 = vmax.f32 %v514_v59, %v547_v4 }
  0xd4   : > { %v537_v35 = vpop.f32.mrf.mxu2 }
  0xd5   : > { %v538_v37 = vadd.f32 %v537_v35, %v424_v22  ;;  %v543_v22 = vmul.f32 0.01, %v502_v9  ;;  %v575_v35 = vld [vmem:[%s1818_s3 + $0x18] sm:$0xff] }
  0xd7   : > { %v555_v41 = vmul.f32 0.01, %v538_v37  ;;  %v559_v18 = vmax.f32 %v502_v9, %v543_v22 }
  0xd9   : > { %v571_v45 = vmax.f32 %v538_v37, %v555_v41  ;;  %v576_v37 = vld [vmem:[%s1818_s3 + $0x20] sm:$0xff]  ;;  %v595_v41 = vpop.permute.xlu1 %594  ;;  %v630_v43 = vpop.permute.xlu2 %629 }
  0xdb   : > { %642 = vmatpush.msra.mxu1 %v571_v45  ;;  %1174 = vmatpush.msra.mxu3 %v571_v45  ;;  %v620_v45 = vpop.permute.xlu0 %619 }
  0xdd   : > { %643 = vmatpush.msra.mxu1 %v570_v49  ;;  %1175 = vmatpush.msra.mxu3 %v570_v49 }
  0xdf   : > { %644 = vmatpush.msra.mxu1 %v569_v52  ;;  %1176 = vmatpush.msra.mxu3 %v569_v52 }
  0xe1   : > { %645 = vmatpush.msra.mxu1 %v568_v56  ;;  %1177 = vmatpush.msra.mxu3 %v568_v56  ;;  %v610_v44 = vpop.permute.xlu1 %609  ;;  %v1607_v46 = vpop.permute.xlu2 %891 }
  0xe3   : > { %646 = vmatpush.msra.mxu1 %v567_v60  ;;  %1178 = vmatpush.msra.mxu3 %v567_v60  ;;  %v1609_v48 = vpop.permute.xlu0 %634 }
  0xe5   : > { %647 = vmatpush.msra.mxu1 %v566_v0  ;;  %1179 = vmatpush.msra.mxu3 %v566_v0 }
  0xe7   : > { %648 = vmatpush.msra.mxu1 %v565_v5  ;;  %1180 = vmatpush.msra.mxu3 %v565_v5 }
  0xe9   : > { %649 = vmatpush.msra.mxu1 %v564_v8  ;;  %1181 = vmatpush.msra.mxu3 %v564_v8  ;;  %v625_v47 = vpop.permute.xlu1 %624  ;;  %v1611_v49 = vpop.permute.xlu2 %906 }
  0xeb   : > { %650 = vmatpush.msra.mxu1 %v563_v11  ;;  %1182 = vmatpush.msra.mxu3 %v563_v11  ;;  %v1615_v51 = vpop.permute.xlu0 %896 }
  0xed   : > { %651 = vmatpush.msra.mxu1 %v562_v17  ;;  %1183 = vmatpush.msra.mxu3 %v562_v17 }
  0xef   : > { %652 = vmatpush.msra.mxu1 %v561_v23  ;;  %1184 = vmatpush.msra.mxu3 %v561_v23 }
  0xf1   : > { %653 = vmatpush.msra.mxu1 %v560_v26  ;;  %1185 = vmatpush.msra.mxu3 %v560_v26  ;;  %v1613_v50 = vpop.permute.xlu1 %639  ;;  %v1617_v52 = vpop.permute.xlu2 %921 }
  0xf3   : > { %654 = vmatpush.msra.mxu1 %v559_v18  ;;  %1186 = vmatpush.msra.mxu3 %v559_v18  ;;  %v1621_v55 = vpop.permute.xlu0 %911 }
  0xf5   : > { %655 = vmatpush.msra.mxu1 %v558_v28  ;;  %1187 = vmatpush.msra.mxu3 %v558_v28 }
  0xf7   : > { %656 = vmatpush.msra.mxu1 %v557_v16  ;;  %1188 = vmatpush.msra.mxu3 %v557_v16 }
  0xf9   : > { %657 = vmatpush.msra.mxu1 %v556_v29  ;;  %1189 = vmatpush.msra.mxu3 %v556_v29  ;;  %v1619_v53 = vpop.permute.xlu1 %901  ;;  %v1626_v59 = vpop.permute.xlu2 %936 }
  0xfa   : > { %658 = vmatmul.f32.vlgmr.msra.gmra.mxu1 %v572_v14  ;;  %673 = vmatmul.f32.vlgmr.msra.gmra.mxu3 %v577_v30 }
  0xfb   : > { %v1635_v2 = vpop.permute.xlu0 %926 }
 0x101   : > { %v1633_v0 = vpop.permute.xlu1 %916  ;;  %v1640_v10 = vpop.permute.xlu2 %986 }
 0x102   : > { %661 = vmatmul.f32.gmra.mxu1 %v573_v31  ;;  %676 = vmatmul.f32.gmra.mxu3 %v578_v32 }
 0x103   : > { %v981_v22 = vpop.permute.xlu0 %980 }
 0x104   : > { %vm1009_vm11 = vcmp.eq.s32.totalorder %v981_v22, 1 }
 0x109   : > { %v1648_v20 = vpop.permute.xlu1 %931 }
 0x10a   : > { %664 = vmatmul.f32.gmra.mxu1 %v574_v33  ;;  %679 = vmatmul.f32.gmra.mxu3 %v579_v34 }
 0x112   : > { %667 = vmatmul.f32.gmra.mxu1 %v575_v35  ;;  %682 = vmatmul.f32.gmra.mxu3 %v580_v36  ;;  %v1666_v35 = vpop.permute.xlu2 %995 }
 0x113   : > { %vm1014_vm2 = vcmp.eq.s32.totalorder %v1666_v35, 1 }
 0x11a   : > { %670 = vmatmul.f32.gmra.mxu1 %v576_v37  ;;  %685 = vmatmul.f32.gmra.mxu3 %v581_v38 }
 0x177   : > { %v659_v54 = vpop.f32.mrf.mxu1 }
 0x178   : > { %v1623_v56 = vadd.f32 %v659_v54, %v595_v41  ;;  %v1679_v54 = vpop.permute.xlu1 %983 }
 0x179   : > { %vm1010_vm7 = vcmp.eq.s32.totalorder %v1679_v54, 1 }
 0x17a   : > { %v1157_v57 = vmul.f32 -1.442695, %v1623_v56 }
 0x17c   : > { %1219 = vpow2.f32 %v1157_v57 }
 0x17d   : > { %v674_v58 = vpop.f32.mrf.mxu3 }
 0x17e   : > { %v1628_v60 = vadd.f32 %v674_v58, %v620_v45 }
 0x17f   : > { %v662_v61 = vpop.f32.mrf.mxu1 }
 0x180   : > { %v1162_v62 = vmul.f32 -1.442695, %v1628_v60  ;;  %v1631_v63 = vadd.f32 %v662_v61, %v600_v39 }
 0x182   : > { %v1220_v1 = vpop.eup %1219  ;;  %1221 = vpow2.f32 %v1162_v62  ;;  %v1158_v4 = vmul.f32 -1.442695, %v1631_v63 }
 0x183   : > { %v719_v5 = vadd.f32 1.0, %v1220_v1 }
 0x184   : > { %1223 = vpow2.f32 %v1158_v4  ;;  %v1689_v4 = vpop.permute.xlu0 %989 }
 0x185   : > { %1225 = vrcp.f32 %v719_v5  ;;  %v677_v6 = vpop.f32.mrf.mxu3  ;;  %v738_v21 = vand.u32 2147483647, %v719_v5  ;;  %v740_v27 = vand.u32 2147483648, %v719_v5  ;;  %vm734_vm12 = vweird.f32 %v719_v5 }
 0x186   : > { %v1638_v7 = vadd.f32 %v677_v6, %v625_v47 }
 0x187   : > { %v665_v8 = vpop.f32.mrf.mxu1  ;;  %vm1658_vm15 = vcmp.eq.f32.partialorder %v738_v21, 8.507059e+37  ;;  %v741_v37 = vor.u32 1.1754944e-38, %v740_v27 }
 0x188   : > { %v1222_v9 = vpop.eup %1221  ;;  %v1163_v11 = vmul.f32 -1.442695, %v1638_v7  ;;  %v1643_v12 = vadd.f32 %v665_v8, %v605_v42 }
 0x189   : > { %v1645_v13 = vadd.f32 1.0, %v1222_v9 }
 0x18a   : > { %v1224_v15 = vpop.eup %1223  ;;  %1227 = vpow2.f32 %v1163_v11  ;;  %v1159_v17 = vmul.f32 -1.442695, %v1643_v12 }
 0x18b   : > { %v1226_v19 = vpop.eup %1225  ;;  %1229 = vrcp.f32 %v1645_v13  ;;  %v1651_v24 = vadd.f32 1.0, %v1224_v15  ;;  %v813_v31 = vand.u32 2147483647, %v1645_v13  ;;  %vm809_vm0 = vweird.f32 %v1645_v13 }
 0x18c   : > { %v730_v23 = vmul.f32 %v1226_v19, %v719_v5  ;;  %1231 = vpow2.f32 %v1159_v17  ;;  %vm735_vm13 = vweird.f32 %v1226_v19  ;;  %v815_v39 = vand.u32 2147483648, %v1645_v13 }
 0x18d   : > { %v680_v25 = vpop.f32.mrf.mxu3  ;;  %1233 = vrcp.f32 %v1651_v24  ;;  %vm736_vm1 = vmor %vm734_vm12, %vm735_vm13  ;;  %v753_v41 = vand.u32 2147483647, %v1651_v24  ;;  %vm1683_vm3 = vcmp.eq.f32.partialorder %v813_v31, 8.507059e+37  ;;  %v755_v62 = vand.u32 2147483648, %v1651_v24 }
 0x18e   : > { %v731_v26 = vsub.f32 1.0, %v730_v23  ;;  %v1654_v18 = vadd.f32 %v680_v25, %v630_v43  ;;  %v816_v8 = vor.u32 1.1754944e-38, %v815_v39  ;;  %vm749_vm5 = vweird.f32 %v1651_v24 }
 0x18f   : > { %v668_v3 = vpop.f32.mrf.mxu1  ;;  %vm1694_vm6 = vcmp.eq.f32.partialorder %v753_v41, 8.507059e+37  ;;  %v756_v25 = vor.u32 1.1754944e-38, %v755_v62 }
 0x190   : > { %v1228_v28 = vpop.eup %1227  ;;  %v732_v16 = vmul.f32 %v1226_v19, %v731_v26  ;;  %v1656_v29 = vadd.f32 %v668_v3, %v610_v44  ;;  %v1164_v33 = vmul.f32 -1.442695, %v1654_v18 }
 0x191   : > { %v1230_v14 = vpop.eup %1229  ;;  %v1663_v32 = vadd.f32 1.0, %v1228_v28 }
 0x192   : > { %v1232_v34 = vpop.eup %1231  ;;  %v733_v36 = vadd.f32 %v1226_v19, %v732_v16  ;;  %v805_v38 = vmul.f32 %v1230_v14, %v1645_v13  ;;  %v1160_v42 = vmul.f32 -1.442695, %v1656_v29  ;;  %vm810_vm4 = vweird.f32 %v1230_v14 }
 0x193   : > { %1235 = vrcp.f32 %v1663_v32  ;;  %v1234_v43 = vpop.eup %1233  ;;  %v1676_v47 = vadd.f32 1.0, %v1232_v34  ;;  %vm811_vm8 = vmor %vm809_vm0, %vm810_vm4  ;;  %vm824_vm10 = vweird.f32 %v1663_v32  ;;  %v830_v13 = vand.u32 2147483648, %v1663_v32 }
 0x194   : > { %v737_v44 = vsel %vm736_vm1, %v1226_v19, %v733_v36  ;;  %v806_v45 = vsub.f32 1.0, %v805_v38  ;;  %1237 = vpow2.f32 %v1164_v33  ;;  %v745_v61 = vmul.f32 %v1234_v43, %v1651_v24 }
 0x195   : > { %v742_v57 = vsel %vm1658_vm15, %v741_v37, %v737_v44  ;;  %v683_v1 = vpop.f32.mrf.mxu3  ;;  %1239 = vrcp.f32 %v1676_v47  ;;  %vm750_vm9 = vweird.f32 %v1234_v43  ;;  %v828_v33 = vand.u32 2147483647, %v1663_v32 }
 0x196   : > { %v939_v5 = vsub.f32 %v742_v57, %v1607_v46  ;;  %v807_v6 = vmul.f32 %v1230_v14, %v806_v45  ;;  %v746_v9 = vsub.f32 1.0, %v745_v61  ;;  %1241 = vpow2.f32 %v1160_v42  ;;  %v999_v45 = vpop.permute.xlu0 %998 }
 0x197   : > { %v1707_v17 = vadd.f32 %v683_v1, %v1609_v48  ;;  %v671_v22 = vpop.f32.mrf.mxu1  ;;  %v770_v58 = vand.u32 2147483648, %v1676_v47  ;;  %vm829_vm0 = vcmp.eq.f32.partialorder %v828_v33, 8.507059e+37  ;;  %vm1015_vm1 = vcmp.eq.s32.totalorder %v999_v45, 1 }
 0x198   : > { %v1019_v46 = vsel %vm1009_vm11, %v939_v5, %v1623_v56  ;;  %v808_v15 = vadd.f32 %v1230_v14, %v807_v6  ;;  %v747_v21 = vmul.f32 %v1234_v43, %v746_v9  ;;  %vm751_vm11 = vmor %vm749_vm5, %vm750_vm9  ;;  %v1729_v37 = vadd.f32 %v671_v22, %v1605_v40  ;;  %v1749_v5 = vpop.permute.xlu1 %992 }
 0x199   : > { %v1236_v19 = vpop.eup %1235  ;;  %v1029_v23 = vpack.c.bf16 %v1019_v46, %v1019_v46  ;;  %v1165_v56 = vmul.f32 -1.442695, %v1707_v17  ;;  %v768_v40 = vand.u32 2147483647, %v1676_v47  ;;  %v771_v11 = vor.u32 1.1754944e-38, %v770_v58 }
 0x19a   : > { %v1238_v26 = vpop.eup %1237  ;;  %v812_v27 = vsel %vm811_vm8, %v1230_v14, %v808_v15  ;;  %v820_v3 = vmul.f32 %v1236_v19, %v1663_v32  ;;  %v748_v28 = vadd.f32 %v1234_v43, %v747_v21  ;;  %vm825_vm12 = vweird.f32 %v1236_v19 }
 0x19b   : > { %1040 = vst.msk [vmem:[%s1701_s22] sm:$0xf] %vm1039_vm14, %v1029_v23  ;;  %v817_v48 = vsel %vm1683_vm3, %v816_v8, %v812_v27  ;;  %v1719_v16 = vadd.f32 1.0, %v1238_v26  ;;  %v1240_v30 = vpop.eup %1239  ;;  %1243 = vpow2.f32 %v1165_v56  ;;  %vm826_vm13 = vmor %vm824_vm10, %vm825_vm12  ;;  %v1161_v35 = vmul.f32 -1.442695, %v1729_v37 }
 0x19c   : > { %v944_v14 = vsub.f32 %v817_v48, %v1633_v0  ;;  %v821_v31 = vsub.f32 1.0, %v820_v3  ;;  %v752_v34 = vsel %vm751_vm11, %v1234_v43, %v748_v28  ;;  %v760_v36 = vmul.f32 %v1240_v30, %v1676_v47  ;;  %v1242_v38 = vpop.eup %1241 }
 0x19d   : > { %1245 = vrcp.f32 %v1719_v16  ;;  %v757_v24 = vsel %vm1694_vm6, %v756_v25, %v752_v34  ;;  %v831_v43 = vor.u32 1.1754944e-38, %v830_v13  ;;  %v1739_v61 = vadd.f32 1.0, %v1242_v38  ;;  %v686_v62 = vpop.f32.mrf.mxu3 }
 0x19e   : > { %v1024_v0 = vsel %vm1014_vm2, %v944_v14, %v1628_v60  ;;  %v822_v39 = vmul.f32 %v1236_v19, %v821_v31  ;;  %v940_v42 = vsub.f32 %v757_v24, %v1615_v51  ;;  %v761_v44 = vsub.f32 1.0, %v760_v36 }
 0x19f   : > { %v1034_v41 = vpack.c.bf16 %v1024_v0, %v1024_v0  ;;  %vm765_vm15 = vweird.f32 %v1240_v30  ;;  %1247 = vrcp.f32 %v1739_v61  ;;  %vm764_vm2 = vweird.f32 %v1676_v47 }
 0x1a0   : > { %v823_v57 = vadd.f32 %v1236_v19, %v822_v39  ;;  %v1020_v60 = vsel %vm1010_vm7, %v940_v42, %v1631_v63  ;;  %v762_v51 = vmul.f32 %v1240_v30, %v761_v44  ;;  %vm766_vm3 = vmor %vm764_vm2, %vm765_vm15  ;;  %v1759_v15 = vadd.f32 %v686_v62, %v1613_v50  ;;  %v1002_v14 = vpop.permute.xlu1 %1001 }
 0x1a1   : > { %1045 = vst.msk [vmem:[%s1701_s22 + $0x14] sm:$0xf] %vm1039_vm14, %v1034_v41  ;;  %v1244_v1 = vpop.eup %1243  ;;  %v1030_v6 = vpack.c.bf16 %v1020_v60, %v1020_v60  ;;  %vm769_vm4 = vcmp.eq.f32.partialorder %v768_v40, 8.507059e+37  ;;  %1249 = vpow2.f32 %v1161_v35  ;;  %v845_v3 = vand.u32 2147483648, %v1719_v16 }
 0x1a2   : > { %v827_v8 = vsel %vm826_vm13, %v1236_v19, %v823_v57  ;;  %v763_v54 = vadd.f32 %v1240_v30, %v762_v51  ;;  %v1761_v23 = vadd.f32 1.0, %v1244_v1  ;;  %vm1011_vm5 = vcmp.eq.s32.totalorder %v1640_v10, 1 }
 0x1a3   : > { %v1246_v9 = vpop.eup %1245  ;;  %v832_v63 = vsel %vm829_vm0, %v831_v43, %v827_v8  ;;  %1041 = vst.msk [vmem:[%s1701_s22 + $0x4] sm:$0xf] %vm1039_vm14, %v1030_v6  ;;  %v1166_v22 = vmul.f32 -1.442695, %v1759_v15  ;;  %vm839_vm7 = vweird.f32 %v1719_v16  ;;  %v783_v33 = vand.u32 2147483647, %v1739_v61  ;;  %v1005_v8 = vpop.permute.xlu2 %1004 }
 0x1a4   : > { %v945_v32 = vsub.f32 %v832_v63, %v1617_v52  ;;  %v835_v46 = vmul.f32 %v1246_v9, %v1719_v16  ;;  %v767_v19 = vsel %vm766_vm3, %v1240_v30, %v763_v54  ;;  %v843_v52 = vand.u32 2147483647, %v1719_v16 }
 0x1a5   : > { %v772_v21 = vsel %vm769_vm4, %v771_v11, %v767_v19  ;;  %1251 = vrcp.f32 %v1761_v23  ;;  %v1248_v50 = vpop.eup %1247  ;;  %vm840_vm6 = vweird.f32 %v1246_v9  ;;  %v846_v30 = vor.u32 1.1754944e-38, %v845_v3 }
 0x1a6   : > { %v1025_v47 = vsel %vm1015_vm1, %v945_v32, %v1638_v7  ;;  %v836_v25 = vsub.f32 1.0, %v835_v46  ;;  %v941_v27 = vsub.f32 %v772_v21, %v1619_v53  ;;  %v775_v48 = vmul.f32 %v1248_v50, %v1739_v61  ;;  %vm841_vm8 = vmor %vm839_vm7, %vm840_vm6 }
 0x1a7   : > { %v1035_v26 = vpack.c.bf16 %v1025_v47, %v1025_v47  ;;  %v1250_v13 = vpop.eup %1249  ;;  %vm844_vm9 = vcmp.eq.f32.partialorder %v843_v52, 8.507059e+37  ;;  %1253 = vpow2.f32 %v1166_v22  ;;  %vm780_vm10 = vweird.f32 %v1248_v50 }
 0x1a8   : > { %v837_v56 = vmul.f32 %v1246_v9, %v836_v25  ;;  %v1021_v7 = vsel %vm1011_vm5, %v941_v27, %v1643_v12  ;;  %v776_v10 = vsub.f32 1.0, %v775_v48  ;;  %v785_v12 = vand.u32 2147483648, %v1739_v61 }
 0x1a9   : > { %1046 = vst.msk [vmem:[%s1701_s22 + $0x18] sm:$0xf] %vm1039_vm14, %v1035_v26  ;;  %v1031_v28 = vpack.c.bf16 %v1021_v7, %v1021_v7  ;;  %v723_v34 = vadd.f32 1.0, %v1250_v13  ;;  %vm1016_vm11 = vcmp.eq.s32.totalorder %v1002_v14, 1  ;;  %vm779_vm12 = vweird.f32 %v1739_v61 }
 0x1aa   : > { %v838_v53 = vadd.f32 %v1246_v9, %v837_v56  ;;  %v777_v0 = vmul.f32 %v1248_v50, %v776_v10  ;;  %vm781_vm13 = vmor %vm779_vm12, %vm780_vm10  ;;  %vm784_vm15 = vcmp.eq.f32.partialorder %v783_v33, 8.507059e+37  ;;  %v786_v42 = vor.u32 1.1754944e-38, %v785_v12 }
 0x1ab   : > { %1042 = vst.msk [vmem:[%s1701_s22 + $0x8] sm:$0xf] %vm1039_vm14, %v1031_v28  ;;  %v1252_v36 = vpop.eup %1251  ;;  %1255 = vrcp.f32 %v723_v34  ;;  %v858_v40 = vand.u32 2147483647, %v1761_v23  ;;  %vm1012_vm1 = vcmp.eq.s32.totalorder %v1689_v4, 1  ;;  %vm854_vm2 = vweird.f32 %v1761_v23  ;;  %v1008_v28 = vpop.permute.xlu0 %1007 }
 0x1ac   : > { %v842_v31 = vsel %vm841_vm8, %v1246_v9, %v838_v53  ;;  %v850_v24 = vmul.f32 %v1252_v36, %v1761_v23  ;;  %v778_v39 = vadd.f32 %v1248_v50, %v777_v0  ;;  %vm855_vm0 = vweird.f32 %v1252_v36 }
 0x1ad   : > { %v847_v38 = vsel %vm844_vm9, %v846_v30, %v842_v31  ;;  %v1254_v44 = vpop.eup %1253  ;;  %vm856_vm3 = vmor %vm854_vm2, %vm855_vm0  ;;  %vm859_vm4 = vcmp.eq.f32.partialorder %v858_v40, 8.507059e+37  ;;  %v800_v4 = vand.u32 2147483648, %v723_v34  ;;  %vm1017_vm5 = vcmp.eq.s32.totalorder %v1005_v8, 1 }
 0x1ae   : > { %v946_v16 = vsub.f32 %v847_v38, %v1635_v2  ;;  %v851_v43 = vsub.f32 1.0, %v850_v24  ;;  %v782_v57 = vsel %vm781_vm13, %v1248_v50, %v778_v39  ;;  %v860_v2 = vand.u32 2147483648, %v1761_v23 }
 0x1af   : > { %v787_v58 = vsel %vm784_vm15, %v786_v42, %v782_v57  ;;  %v728_v51 = vadd.f32 1.0, %v1254_v44  ;;  %v798_v46 = vand.u32 2147483647, %v723_v34  ;;  %vm794_vm7 = vweird.f32 %v723_v34 }
 0x1b0   : > { %v1026_v41 = vsel %vm1016_vm11, %v946_v16, %v1654_v18  ;;  %v852_v60 = vmul.f32 %v1252_v36, %v851_v43  ;;  %v942_v61 = vsub.f32 %v787_v58, %v1611_v49  ;;  %v861_v1 = vor.u32 1.1754944e-38, %v860_v2 }
 0x1b1   : > { %v1036_v45 = vpack.c.bf16 %v1026_v41, %v1026_v41  ;;  %v1256_v18 = vpop.eup %1255  ;;  %1257 = vrcp.f32 %v728_v51  ;;  %v801_v25 = vor.u32 1.1754944e-38, %v800_v4  ;;  %vm799_vm9 = vcmp.eq.f32.partialorder %v798_v46, 8.507059e+37 }
 0x1b2   : > { %v853_v35 = vadd.f32 %v1252_v36, %v852_v60  ;;  %v1022_v62 = vsel %vm1012_vm1, %v942_v61, %v1656_v29  ;;  %v790_v6 = vmul.f32 %v1256_v18, %v723_v34  ;;  %vm795_vm6 = vweird.f32 %v1256_v18 }
 0x1b3   : > { %1047 = vst.msk [vmem:[%s1701_s22 + $0x1c] sm:$0xf] %vm1039_vm14, %v1036_v45  ;;  %v1032_v9 = vpack.c.bf16 %v1022_v62, %v1022_v62  ;;  %vm796_vm8 = vmor %vm794_vm7, %vm795_vm6  ;;  %v875_v27 = vand.u32 2147483648, %v728_v51  ;;  %v873_v56 = vand.u32 2147483647, %v728_v51  ;;  %vm1013_vm11 = vcmp.eq.s32.totalorder %v1749_v5, 1 }
 0x1b4   : > { %v857_v63 = vsel %vm856_vm3, %v1252_v36, %v853_v35  ;;  %v791_v32 = vsub.f32 1.0, %v790_v6  ;;  %vm869_vm12 = vweird.f32 %v728_v51  ;;  %vm1018_vm0 = vcmp.eq.s32.totalorder %v1008_v28, 1 }
 0x1b5   : > { %v862_v54 = vsel %vm859_vm4, %v861_v1, %v857_v63  ;;  %1043 = vst.msk [vmem:[%s1701_s22 + $0xc] sm:$0xf] %vm1039_vm14, %v1032_v9  ;;  %v876_v48 = vor.u32 1.1754944e-38, %v875_v27  ;;  %vm874_vm15 = vcmp.eq.f32.partialorder %v873_v56, 8.507059e+37 }
 0x1b6   : > { %v947_v49 = vsub.f32 %v862_v54, %v1648_v20  ;;  %v792_v11 = vmul.f32 %v1256_v18, %v791_v32 }
 0x1b7   : > { %v1258_v29 = vpop.eup %1257 }
 0x1b8   : > { %v1027_v19 = vsel %vm1017_vm5, %v947_v49, %v1707_v17  ;;  %v793_v47 = vadd.f32 %v1256_v18, %v792_v11  ;;  %v865_v21 = vmul.f32 %v1258_v29, %v728_v51  ;;  %vm870_vm10 = vweird.f32 %v1258_v29 }
 0x1b9   : > { %v1037_v23 = vpack.c.bf16 %v1027_v19, %v1027_v19  ;;  %vm871_vm13 = vmor %vm869_vm12, %vm870_vm10 }
 0x1ba   : > { %v797_v52 = vsel %vm796_vm8, %v1256_v18, %v793_v47  ;;  %v866_v26 = vsub.f32 1.0, %v865_v21 }
 0x1bb   : > { %1048 = vst.msk [vmem:[%s1701_s22 + $0x20] sm:$0xf] %vm1039_vm14, %v1037_v23  ;;  %v802_v20 = vsel %vm799_vm9, %v801_v25, %v797_v52 }
 0x1bc   : > { %v943_v3 = vsub.f32 %v802_v20, %v1621_v55  ;;  %v867_v50 = vmul.f32 %v1258_v29, %v866_v26 }
 0x1be   : > { %v1023_v17 = vsel %vm1013_vm11, %v943_v3, %v1729_v37  ;;  %v868_v22 = vadd.f32 %v1258_v29, %v867_v50 }
 0x1bf   : > { %v1033_v7 = vpack.c.bf16 %v1023_v17, %v1023_v17 }
 0x1c0   : > { %v872_v53 = vsel %vm871_vm13, %v1258_v29, %v868_v22 }
 0x1c1   : > { %1044 = vst.msk [vmem:[%s1701_s22 + $0x10] sm:$0xf] %vm1039_vm14, %v1033_v7  ;;  %v877_v13 = vsel %vm874_vm15, %v876_v48, %v872_v53 }
 0x1c2   : > { %v948_v55 = vsub.f32 %v877_v13, %v1626_v59 }
 0x1c4   : > { %v1028_v30 = vsel %vm1018_vm0, %v948_v55, %v1759_v15 }
 0x1c5   : > { %v1038_v5 = vpack.c.bf16 %v1028_v30, %v1028_v30 }
 0x1c7   : > { %1049 = vst.msk [vmem:[%s1701_s22 + $0x24] sm:$0xf] %vm1039_vm14, %v1038_v5 }
 0x1c8 PF: > { %s17_s26 = sadd.s32 1, %s1281_s26   ;;  %s1829_s24 = smov %s1277_s25 }
 0x1c9   : > { %p14_p5 = scmp.ge.s32.totalorder %s17_s26, 4   ;;  %s1830_s25 = smov %s1832_s27 }
 0x1cb   :  { %16 = sbr.rel (!%p14_p5) target bundleno = 2 (0x2), region = 78 }

</bundles_post_ra>
